<compile_context>
chip_gen: v7x
topology: tpu7x:2x2x1
jax: 0.10.0
libtpu: 0.0.40
codegen_flags: <defaults>
</compile_context>

<pallas_src>
import numpy as np
import jax
import jax.numpy as jnp
from jax import lax
from jax.experimental import pallas as pl
from jax.experimental.pallas import tpu as pltpu


def _round_up(x, m):
    return ((x + m - 1) // m) * m


# ----------------------------- Pallas kernel ------------------------------ #

def _gemm_kernel(a_ref, b_ref, o_ref, acc_ref):
    # grid = (M tiles, N tiles, K tiles); K is the last ("arbitrary") reduction
    # axis, accumulated in a f32 VMEM scratch that stays resident across K.
    @pl.when(pl.program_id(2) == 0)
    def _():
        acc_ref[...] = jnp.zeros_like(acc_ref)

    acc_ref[...] += jnp.dot(a_ref[...], b_ref[...],
                            preferred_element_type=jnp.float32)

    @pl.when(pl.program_id(2) == pl.num_programs(2) - 1)
    def _():
        o_ref[...] = acc_ref[...].astype(o_ref.dtype)


def pallas_matmul(a, b):
    """(M, Kd) @ (Kd, N) -> (M, N) float32.  a/b are typically bf16.

    Pads Kd and N up to multiples of 128 (lane-dense MXU feeds / stores),
    tiles all three GEMM axes and accumulates over K in VMEM.
    """
    M, Kd = a.shape
    Kd2, N = b.shape
    assert Kd == Kd2

    # Lane-dense padding of the contraction and output dims.
    Kp = _round_up(Kd, 128)
    Np = _round_up(N, 128)

    # Large M tiles amortize the ~0.35 us per-grid-step overhead; cap at 512 so
    # the working set stays far below v7x's 64 MiB VMEM as well.
    tm = min(512, _round_up(M, 16))
    Mp = _round_up(M, tm)
    tk = 512 if Kp % 512 == 0 else (256 if Kp % 256 == 0 else 128)
    tn = 256 if Np % 256 == 0 else 128   # 256-wide when possible (v6e/v7x MXU)

    # One fused zero-pad per operand (zero rows/cols do not change the result).
    if (Mp, Kp) != (M, Kd):
        a = jnp.pad(a, ((0, Mp - M), (0, Kp - Kd)))
    if (Kp, Np) != (Kd, N):
        b = jnp.pad(b, ((0, Kp - Kd), (0, Np - N)))

    grid = (Mp // tm, Np // tn, Kp // tk)
    cost = pl.CostEstimate(
        flops=2 * Mp * Np * Kp,
        transcendentals=0,
        bytes_accessed=(Mp * Kp * a.dtype.itemsize
                        + Kp * Np * b.dtype.itemsize
                        + Mp * Np * 4),
    )

    out = pl.pallas_call(
        _gemm_kernel,
        out_shape=jax.ShapeDtypeStruct((Mp, Np), jnp.float32),
        grid_spec=pltpu.PrefetchScalarGridSpec(
            num_scalar_prefetch=0,
            grid=grid,
            in_specs=[
                pl.BlockSpec((tm, tk), lambda i, j, k: (i, k)),  # patch tile
                pl.BlockSpec((tk, tn), lambda i, j, k: (k, j)),  # weight tile
            ],
            out_specs=pl.BlockSpec((tm, tn), lambda i, j, k: (i, j)),
            scratch_shapes=[pltpu.VMEM((tm, tn), jnp.float32)],
        ),
        compiler_params=pltpu.CompilerParams(
            dimension_semantics=("parallel", "parallel", "arbitrary"),
            vmem_limit_bytes=64 * 1024 * 1024,
        ),
        cost_estimate=cost,
    )(a, b)
    return out[:M, :N]


# ------------------------------ JAX glue ---------------------------------- #

def _im2col(x, K, stride, padding, dilation, dtype=jnp.bfloat16):
    """x: (B, C, H, W) -> patches (B*Ho*Wo, C*K*K) in `dtype`, plus (Ho, Wo).

    Column order is c*K*K + kh*K + kw, matching conv_w.reshape(C_out, C*K*K).
    """
    # TODO(synk): replace this HBM-materialized im2col (9x activation blow-up)
    # with K*K shifted matmuls read directly from x inside the kernel.
    B, C, H, W = x.shape
    x = x.astype(dtype)                       # halve HBM traffic of the 9x copy
    xp = jnp.pad(x, ((0, 0), (0, 0), (padding, padding), (padding, padding)))
    Ho = (H + 2 * padding - dilation * (K - 1) - 1) // stride + 1
    Wo = (W + 2 * padding - dilation * (K - 1) - 1) // stride + 1
    cols = []
    for kh in range(K):
        for kw in range(K):
            h0 = kh * dilation
            w0 = kw * dilation
            patch = xp[:, :,
                       h0:h0 + stride * (Ho - 1) + 1:stride,
                       w0:w0 + stride * (Wo - 1) + 1:stride]   # (B, C, Ho, Wo)
            cols.append(patch)
    col = jnp.stack(cols, axis=2)                 # (B, C, K*K, Ho, Wo)
    col = col.transpose(0, 3, 4, 1, 2)            # (B, Ho, Wo, C, K*K)
    col = col.reshape(B * Ho * Wo, C * K * K)
    return col, Ho, Wo


def flgc_forward(x, conv_w, S, T, *, stride=1, padding=0, dilation=1,
                 group_num=1):
    """FLGC training-mode forward. x: (B, C_in, H, W) -> (B, C_out, Ho, Wo)."""
    C_out, C_in, K, _ = conv_w.shape
    s_hat = jax.nn.softmax(S, axis=1)                       # (C_in, G)
    t_hat = jax.nn.softmax(T, axis=1)                       # (C_out, G)
    g_in = jnp.argmax(s_hat, axis=1)                        # group of each input ch
    g_out = jnp.argmax(t_hat, axis=1)                       # group of each filter
    s_scale = jnp.take_along_axis(s_hat, g_in[:, None], axis=1)[:, 0]    # (C_in,)
    t_scale = jnp.take_along_axis(t_hat, g_out[:, None], axis=1)[:, 0]   # (C_out,)
    mask = (g_out[:, None] == g_in[None, :]).astype(conv_w.dtype)        # (C_out, C_in)

    # Effective dense weight (parameter setup — plain JAX glue, f32).
    w_eff = conv_w * (t_scale[:, None] * s_scale[None, :] * mask)[:, :, None, None]

    # Conv as im2col + Pallas GEMM (hot path): bf16 operands, f32 accumulation.
    col, Ho, Wo = _im2col(x, K, stride, padding, dilation,
                          dtype=jnp.bfloat16)                     # (M, C_in*K*K)
    w_mat = w_eff.reshape(C_out, C_in * K * K).T.astype(jnp.bfloat16)
    out = pallas_matmul(col, w_mat)                               # (M, C_out) f32

    B = x.shape[0]
    # Back to NCHW to preserve the module's output layout.
    # TODO(synk): keep NHWC / (M, C_out) and fold this transpose into the
    # consumer when FLGC layers are chained (extra HBM pass otherwise).
    out = out.reshape(B, Ho, Wo, C_out).transpose(0, 3, 1, 2)
    return out


# -------------------------- Faithful reference ----------------------------- #

def flgc_reference(x, conv_w, S, T, *, stride, padding, dilation, group_num):
    """Plain-JAX/numpy replica of the PyTorch per-group loop (for checking)."""
    x_np = np.asarray(x)
    w_np = np.asarray(conv_w)
    s_hat = np.asarray(jax.nn.softmax(S, axis=1))
    t_hat = np.asarray(jax.nn.softmax(T, axis=1))
    s = s_hat.argmax(1)
    t = t_hat.argmax(1)
    B, C_in, H, W = x_np.shape
    C_out, _, K, _ = w_np.shape
    Ho = (H + 2 * padding - dilation * (K - 1) - 1) // stride + 1
    Wo = (W + 2 * padding - dilation * (K - 1) - 1) // stride + 1

    outs, out_index = [], []
    for i in range(group_num):
        x_idx = np.where(s == i)[0]
        f_idx = np.where(t == i)[0]
        out_index += list(f_idx)
        if len(f_idx) == 0:
            continue
        if len(x_idx) == 0:
            outs.append(np.zeros((B, len(f_idx), Ho, Wo), np.float32))
            continue
        xi = x_np[:, x_idx] * s_hat[x_idx, i].reshape(1, -1, 1, 1)
        ti = w_np[f_idx][:, x_idx] * t_hat[f_idx, i].reshape(-1, 1, 1, 1)
        oi = lax.conv_general_dilated(
            jnp.asarray(xi), jnp.asarray(ti),
            window_strides=(stride, stride),
            padding=[(padding, padding), (padding, padding)],
            rhs_dilation=(dilation, dilation))
        outs.append(np.asarray(oi))
    out = np.concatenate(outs, axis=1)
    inv = np.zeros(C_out, dtype=np.int64)
    inv[np.array(out_index, dtype=np.int64)] = np.arange(C_out)
    return out[:, inv]


# --------------------------------- main ------------------------------------ #

if __name__ == "__main__":
    B, C_in, C_out, H, W = 2, 4, 8, 16, 16
    K, G = 3, 2
    stride, padding, dilation = 1, 1, 1

    key = jax.random.PRNGKey(0)
    k1, k2, k3, k4 = jax.random.split(key, 4)
    x = jax.random.normal(k1, (B, C_in, H, W), jnp.float32)
    conv_w = jax.random.normal(k2, (C_out, C_in, K, K), jnp.float32)
    S = jax.random.normal(k3, (C_in, G), jnp.float32)
    T = jax.random.normal(k4, (C_out, G), jnp.float32)

    out = flgc_forward(x, conv_w, S, T, stride=stride, padding=padding,
                       dilation=dilation, group_num=G)
    out = jax.block_until_ready(out)

    ref = flgc_reference(x, conv_w, S, T, stride=stride, padding=padding,
                         dilation=dilation, group_num=G)
    assert out.shape == (B, C_out, H, W), out.shape
    # bf16 operands / f32 accumulation -> relaxed tolerance vs. f32 reference.
    rel_err = np.max(np.abs(np.asarray(out) - ref)) / (np.max(np.abs(ref)) + 1e-6)
    assert rel_err < 2e-2, f"mismatch vs reference (rel err {rel_err:.4f})"

    print("KERNEL_OK")
</pallas_src>

<mosaic_0001>
module attributes {stable_mosaic.version = 11 : i64} {
  func.func @_gemm_kernel(%arg0: i32, %arg1: i32, %arg2: i32, %arg3: memref<512x128xbf16, #tpu.memory_space<vmem>>, %arg4: memref<128x128xbf16, #tpu.memory_space<vmem>>, %arg5: memref<512x128xf32, #tpu.memory_space<vmem>>, %arg6: memref<512x128xf32, #tpu.memory_space<vmem>>) attributes {dimension_semantics = [#tpu.dimension_semantics<parallel>, #tpu.dimension_semantics<parallel>, #tpu.dimension_semantics<arbitrary>], iteration_bounds = array<i64: 1, 1, 1>, scalar_prefetch = 0 : i64, scratch_operands = 1 : i64, tpu.core_type = #tpu.core_type<tc>, window_params = [{transform_indices = @transform_0, window_bounds = array<i64: 512, 128>}, {transform_indices = @transform_1, window_bounds = array<i64: 128, 128>}, {transform_indices = @transform_2, window_bounds = array<i64: 512, 128>}]} {
    %c0_i32 = arith.constant 0 : i32
    %0 = arith.cmpi eq, %arg2, %c0_i32 : i32
    %1 = arith.extui %0 : i1 to i32
    %c0_i32_0 = arith.constant 0 : i32
    %2 = arith.cmpi ne, %1, %c0_i32_0 : i32
    scf.if %2 {
      %cst_10 = arith.constant 0.000000e+00 : f32
      %12 = vector.broadcast %cst_10 : f32 to vector<512x128xf32>
      %c0_11 = arith.constant 0 : index
      %c0_12 = arith.constant 0 : index
      %13 = vector.load %arg6[%c0_11, %c0_12] : memref<512x128xf32, #tpu.memory_space<vmem>>, vector<512x128xf32>
      tpu.vector_store %arg6[%c0_11, %c0_12], %12 {strides = array<i32>} : memref<512x128xf32, #tpu.memory_space<vmem>>, vector<512x128xf32>,
    } else {
    }
    %c0 = arith.constant 0 : index
    %c0_1 = arith.constant 0 : index
    %3 = vector.load %arg6[%c0, %c0_1] : memref<512x128xf32, #tpu.memory_space<vmem>>, vector<512x128xf32>
    %c0_2 = arith.constant 0 : index
    %c0_3 = arith.constant 0 : index
    %4 = vector.load %arg3[%c0_2, %c0_3] : memref<512x128xbf16, #tpu.memory_space<vmem>>, vector<512x128xbf16>
    %c0_4 = arith.constant 0 : index
    %c0_5 = arith.constant 0 : index
    %5 = vector.load %arg4[%c0_4, %c0_5] : memref<128x128xbf16, #tpu.memory_space<vmem>>, vector<128x128xbf16>
    %cst = arith.constant dense<0.000000e+00> : vector<512x128xf32>
    %6 = tpu.matmul %4, %5, %cst {dimension_numbers = #tpu.dot_dimension_numbers<[1], [0], [0], [1], [0, 0, 1, 1], [], []>} : vector<512x128xbf16>, vector<128x128xbf16>, vector<512x128xf32> -> vector<512x128xf32>
    %7 = arith.addf %3, %6 : vector<512x128xf32>
    %c0_6 = arith.constant 0 : index
    %c0_7 = arith.constant 0 : index
    %8 = vector.load %arg6[%c0_6, %c0_7] : memref<512x128xf32, #tpu.memory_space<vmem>>, vector<512x128xf32>
    tpu.vector_store %arg6[%c0_6, %c0_7], %7 {strides = array<i32>} : memref<512x128xf32, #tpu.memory_space<vmem>>, vector<512x128xf32>,
    %c0_i32_8 = arith.constant 0 : i32
    %9 = arith.cmpi eq, %arg2, %c0_i32_8 : i32
    %10 = arith.extui %9 : i1 to i32
    %c0_i32_9 = arith.constant 0 : i32
    %11 = arith.cmpi ne, %10, %c0_i32_9 : i32
    scf.if %11 {
      %c0_10 = arith.constant 0 : index
      %c0_11 = arith.constant 0 : index
      %12 = vector.load %arg6[%c0_10, %c0_11] : memref<512x128xf32, #tpu.memory_space<vmem>>, vector<512x128xf32>
      %c0_12 = arith.constant 0 : index
      %c0_13 = arith.constant 0 : index
      %13 = vector.load %arg5[%c0_12, %c0_13] : memref<512x128xf32, #tpu.memory_space<vmem>>, vector<512x128xf32>
      tpu.vector_store %arg5[%c0_12, %c0_13], %12 {strides = array<i32>} : memref<512x128xf32, #tpu.memory_space<vmem>>, vector<512x128xf32>,
    } else {
    }
    return
  }
  func.func @transform_0(%arg0: i32, %arg1: i32, %arg2: i32) -> (i32, i32) {
    %c0_i32 = arith.constant 0 : i32
    return %arg0, %arg2 : i32, i32
  }
  func.func @transform_1(%arg0: i32, %arg1: i32, %arg2: i32) -> (i32, i32) {
    %c0_i32 = arith.constant 0 : i32
    return %arg2, %arg1 : i32, i32
  }
  func.func @transform_2(%arg0: i32, %arg1: i32, %arg2: i32) -> (i32, i32) {
    %c0_i32 = arith.constant 0 : i32
    return %arg0, %arg1 : i32, i32
  }
}

</mosaic_0001>

<bundles_post_ra>
// kernel: tpu_custom_call.1
= control target key start
LH: loop header
LB: loop body
LE: loop exit
PB: predicated region body
PF: predicated region fallthrough
CT: control target
= control target key end

     0   :  { %7 = vsyncpa [#allocation4], 0  ;;  %s1412_s0 = inlined_call_operand.hbm [shape: bf16[512,128], index: 0, kind: input, shape index: {}]   ;;  %s1413_s1 = inlined_call_operand.hbm [shape: bf16[128,128], index: 1, kind: input, shape index: {}]   ;;  %s1414_s2 = inlined_call_operand.hbm [shape: f32[512,128], index: 2, kind: output, shape index: {}]  }
   0x1   :  { %8 = vsyncpa [#allocation7], 0 }
   0x2   :  { %9 = vsyncpa [#allocation5], 0  ;;  %s1354_s9 = smov [#allocation3]   ;;  %s1282_s13 = scalar_lea.hbm %s1412_s0, 4096 }
   0x3   :  { %s15_s10 = sshll.u32 %s1354_s9, 4  ;;  %p1283_p0 = scmp.ne.s32.totalorder %s1412_s0, %s1282_s13  ;;  %s16_s10 = int_to_ptr.vmem [resolvable:$true] %s15_s10 }
   0x4   :  { %p1286_p1 = scmp.lt.u32.totalorder %s1282_s13, %s1412_s0 }
   0x6   :  { %p1288_p2 = pnand %p1286_p1, %p1283_p0 }
   0x8   :  { %1291 = shalt.err (!%p1288_p2)
}
   0x9   :  { %s1292_s18 = scalar_lea.vmem %s16_s10, 4096  ;;  %p1297_p4 = scmp.lt.s32.totalorder %s16_s10, %s16_s10 }
   0xa   :  { %p1293_p3 = scmp.ne.s32.totalorder %s16_s10, %s1292_s18  ;;  %p1298_p5 = scmp.lt.s32.totalorder %s1292_s18, %s1292_s18 }
   0xc   :  { %p1299_p6 = por %p1298_p5, %p1297_p4 }
   0xe   :  { %p1300_p7 = pnand %p1299_p6, %p1293_p3 }
  0x10   :  { %1303 = shalt.err (!%p1300_p7)
}
  0x11   :  { %s1355_s19 = smov 64   ;;  %s1356_s20 = smov 4  }
  0x12   :  { %21 = dma.hbm_to_vmem [thread:$0]  %s1412_s0, 4096, %s16_s10, [#allocation4], %s1355_s19, %s1355_s19, %s1356_s20  }
  0x13   :  { %s1357_s23 = smov [#allocation6]   ;;  %s1304_s27 = scalar_lea.hbm %s1413_s1, 1024 }
  0x14   :  { %s27_s24 = sshll.u32 %s1357_s23, 4  ;;  %p1305_p8 = scmp.ne.s32.totalorder %s1413_s1, %s1304_s27  ;;  %s28_s24 = int_to_ptr.vmem [resolvable:$true] %s27_s24 }
  0x15   :  { %p1308_p9 = scmp.lt.u32.totalorder %s1304_s27, %s1413_s1 }
  0x17   :  { %p1310_p10 = pnand %p1308_p9, %p1305_p8 }
  0x19   :  { %1313 = shalt.err (!%p1310_p10)
}
  0x1a   :  { %s1314_s4 = scalar_lea.vmem %s28_s24, 1024  ;;  %p1319_p12 = scmp.lt.s32.totalorder %s28_s24, %s28_s24 }
  0x1b   :  { %p1315_p11 = scmp.ne.s32.totalorder %s28_s24, %s1314_s4  ;;  %p1320_p13 = scmp.lt.s32.totalorder %s1314_s4, %s1314_s4 }
  0x1d   :  { %p1321_p0 = por %p1320_p13, %p1319_p12 }
  0x1f   :  { %p1322_p1 = pnand %p1321_p0, %p1315_p11 }
  0x21   :  { %1325 = shalt.err (!%p1322_p1)
}
  0x22   :  { %33 = dma.hbm_to_vmem [thread:$0]  %s1413_s1, 1024, %s28_s24, [#allocation7], %s1355_s19, %s1355_s19, %s1356_s20  }
  0x23   :  { %1348 = dma.done.wait [#allocation4], 4096  }
  0x24   :  { %1349 = vsyncadd [#allocation4], 4294963200 }
  0x25   :  { %1350 = dma.done.wait [#allocation7], 1024  }
  0x26   :  { %1351 = vsyncadd [#allocation7], 4294966272  ;;  %v1242_v0 = vld [vmem:[#allocation6] sm:$0xff]   ;;  %v1243_v1 = vld [vmem:[#allocation6 + $0x8] sm:$0xff]   ;;  %s1358_s1 = smov [#allocation8]  }
  0x27   :  { %1139 = vmatprep.subr.bf16.mxu0 %v1242_v0  ;;  %1219 = vmatprep.subr.bf16.mxu1 %v1242_v0  ;;  %v1244_v2 = vld [vmem:[#allocation6 + $0x10] sm:$0xff]   ;;  %v1245_v3 = vld [vmem:[#allocation6 + $0x18] sm:$0xff]   ;;  %v1250_v4 = vld [vmem:[#allocation3] sm:$0xff]   ;;  %s1046_s6 = sshll.u32 %s1358_s1, 4  ;;  %s1047_s6 = int_to_ptr.vmem [resolvable:$true] %s1046_s6 }
  0x28   :  { %1140 = vmatpush3.bf16.msra.mxu0 %v1242_v0  ;;  %1227 = vmatpush3.bf16.msra.mxu1 %v1242_v0  ;;  %v1251_v5 = vld [vmem:[#allocation3 + $0x80] sm:$0xff]   ;;  %v1247_v7 = vld [vmem:[#allocation6 + $0x28] sm:$0xff]   ;;  %v1248_v8 = vld [vmem:[#allocation6 + $0x30] sm:$0xff]   ;;  %s1326_s7 = scalar_lea.vmem %s1047_s6, 8192  ;;  %p1331_p3 = scmp.lt.s32.totalorder %s1047_s6, %s1047_s6 }
  0x29   :  { %1141 = vmatprep.subr.bf16.mxu0 %v1243_v1  ;;  %1220 = vmatprep.subr.bf16.mxu1 %v1243_v1  ;;  %v1246_v6 = vld [vmem:[#allocation6 + $0x20] sm:$0xff]   ;;  %v1249_v9 = vld [vmem:[#allocation6 + $0x38] sm:$0xff]   ;;  %v1252_v10 = vld [vmem:[#allocation3 + $0x8] sm:$0xff]   ;;  %p1327_p2 = scmp.ne.s32.totalorder %s1047_s6, %s1326_s7  ;;  %p1332_p4 = scmp.lt.s32.totalorder %s1326_s7, %s1326_s7 }
  0x2a   :  { %1155 = vmatprep.mubr.bf16.mxu0 %v1250_v4  ;;  %1187 = vmatprep.mubr.bf16.mxu1 %v1251_v5  ;;  %v1253_v11 = vld [vmem:[#allocation3 + $0x88] sm:$0xff]   ;;  %v1254_v12 = vld [vmem:[#allocation3 + $0x10] sm:$0xff]   ;;  %v1256_v14 = vld [vmem:[#allocation3 + $0x18] sm:$0xff]  }
  0x2b   :  { %v1255_v13 = vld [vmem:[#allocation3 + $0x90] sm:$0xff]   ;;  %v1257_v15 = vld [vmem:[#allocation3 + $0x98] sm:$0xff]   ;;  %v1258_v16 = vld [vmem:[#allocation3 + $0x20] sm:$0xff]   ;;  %p1333_p5 = por %p1332_p4, %p1331_p3 }
  0x2c   :  { %1142 = vmatpush3.bf16.msra.mxu0 %v1243_v1  ;;  %1228 = vmatpush3.bf16.msra.mxu1 %v1243_v1  ;;  %v1259_v17 = vld [vmem:[#allocation3 + $0xa0] sm:$0xff]   ;;  %v1260_v18 = vld [vmem:[#allocation3 + $0x28] sm:$0xff]   ;;  %v1262_v20 = vld [vmem:[#allocation3 + $0x30] sm:$0xff]  }
  0x2d   :  { %1143 = vmatprep.subr.bf16.mxu0 %v1244_v2  ;;  %1221 = vmatprep.subr.bf16.mxu1 %v1244_v2  ;;  %v1261_v19 = vld [vmem:[#allocation3 + $0xa8] sm:$0xff]   ;;  %v1263_v21 = vld [vmem:[#allocation3 + $0xb0] sm:$0xff]   ;;  %v1264_v22 = vld [vmem:[#allocation3 + $0x38] sm:$0xff]   ;;  %p1334_p6 = pnand %p1333_p5, %p1327_p2 }
  0x2e   :  { %v1265_v23 = vld [vmem:[#allocation3 + $0xb8] sm:$0xff]   ;;  %v1266_v24 = vld [vmem:[#allocation3 + $0x40] sm:$0xff]   ;;  %v1268_v26 = vld [vmem:[#allocation3 + $0x48] sm:$0xff]  }
  0x2f   :  { %v1267_v25 = vld [vmem:[#allocation3 + $0xc0] sm:$0xff]   ;;  %v1269_v27 = vld [vmem:[#allocation3 + $0xc8] sm:$0xff]   ;;  %v1270_v28 = vld [vmem:[#allocation3 + $0x50] sm:$0xff]  }
  0x30   :  { %1144 = vmatpush3.bf16.msra.mxu0 %v1244_v2  ;;  %1229 = vmatpush3.bf16.msra.mxu1 %v1244_v2  ;;  %v1271_v29 = vld [vmem:[#allocation3 + $0xd0] sm:$0xff]   ;;  %v1272_v30 = vld [vmem:[#allocation3 + $0x58] sm:$0xff]   ;;  %v1274_v32 = vld [vmem:[#allocation3 + $0x60] sm:$0xff]  }
  0x31   :  { %1145 = vmatprep.subr.bf16.mxu0 %v1245_v3  ;;  %1222 = vmatprep.subr.bf16.mxu1 %v1245_v3  ;;  %v1273_v31 = vld [vmem:[#allocation3 + $0xd8] sm:$0xff]   ;;  %v1275_v33 = vld [vmem:[#allocation3 + $0xe0] sm:$0xff]   ;;  %v1276_v34 = vld [vmem:[#allocation3 + $0x68] sm:$0xff]  }
  0x32   :  { %v1277_v35 = vld [vmem:[#allocation3 + $0xe8] sm:$0xff]   ;;  %v1278_v36 = vld [vmem:[#allocation3 + $0x70] sm:$0xff]   ;;  %v1280_v38 = vld [vmem:[#allocation3 + $0x78] sm:$0xff]  }
  0x33   :  { %v1279_v37 = vld [vmem:[#allocation3 + $0xf0] sm:$0xff]   ;;  %v1281_v39 = vld [vmem:[#allocation3 + $0xf8] sm:$0xff]  }
  0x34   :  { %1146 = vmatpush3.bf16.msra.mxu0 %v1245_v3  ;;  %1230 = vmatpush3.bf16.msra.mxu1 %v1245_v3 }
  0x35   :  { %1147 = vmatprep.subr.bf16.mxu0 %v1246_v6  ;;  %1223 = vmatprep.subr.bf16.mxu1 %v1246_v6 }
  0x38   :  { %1148 = vmatpush3.bf16.msra.mxu0 %v1246_v6  ;;  %1231 = vmatpush3.bf16.msra.mxu1 %v1246_v6 }
  0x39   :  { %1149 = vmatprep.subr.bf16.mxu0 %v1247_v7  ;;  %1224 = vmatprep.subr.bf16.mxu1 %v1247_v7 }
  0x3c   :  { %1150 = vmatpush3.bf16.msra.mxu0 %v1247_v7  ;;  %1232 = vmatpush3.bf16.msra.mxu1 %v1247_v7 }
  0x3d   :  { %1151 = vmatprep.subr.bf16.mxu0 %v1248_v8  ;;  %1225 = vmatprep.subr.bf16.mxu1 %v1248_v8 }
  0x40   :  { %1152 = vmatpush3.bf16.msra.mxu0 %v1248_v8  ;;  %1233 = vmatpush3.bf16.msra.mxu1 %v1248_v8 }
  0x41   :  { %1153 = vmatprep.subr.bf16.mxu0 %v1249_v9  ;;  %1226 = vmatprep.subr.bf16.mxu1 %v1249_v9 }
  0x44   :  { %1154 = vmatpush3.bf16.msra.mxu0 %v1249_v9  ;;  %1234 = vmatpush3.bf16.msra.mxu1 %v1249_v9 }
  0x47   :  { %1156 = vmatmul.mubr.bf16.vlgmr.msra.gmra.mrb[0].mxu0 %v1252_v10  ;;  %1188 = vmatmul.mubr.bf16.vlgmr.msra.gmra.mrb[0].mxu1 %v1253_v11 }
  0x48   :  { %1159 = vmatprep.mubr.bf16.mxu0 %v1254_v12  ;;  %1191 = vmatprep.mubr.bf16.mxu1 %v1255_v13 }
  0x4f   :  { %1160 = vmatmul.mubr.bf16.gmra.mrb[4].mxu0 %v1256_v14  ;;  %1192 = vmatmul.mubr.bf16.gmra.mrb[4].mxu1 %v1257_v15 }
  0x50   :  { %1163 = vmatprep.mubr.bf16.mxu0 %v1258_v16  ;;  %1195 = vmatprep.mubr.bf16.mxu1 %v1259_v17 }
  0x57   :  { %1164 = vmatmul.mubr.bf16.gmra.mrb[8].mxu0 %v1260_v18  ;;  %1196 = vmatmul.mubr.bf16.gmra.mrb[8].mxu1 %v1261_v19 }
  0x58   :  { %1167 = vmatprep.mubr.bf16.mxu0 %v1262_v20  ;;  %1199 = vmatprep.mubr.bf16.mxu1 %v1263_v21 }
  0x5f   :  { %1168 = vmatmul.mubr.bf16.gmra.mrb[12].mxu0 %v1264_v22  ;;  %1200 = vmatmul.mubr.bf16.gmra.mrb[12].mxu1 %v1265_v23 }
  0x60   :  { %1171 = vmatprep.mubr.bf16.mxu0 %v1266_v24  ;;  %1203 = vmatprep.mubr.bf16.mxu1 %v1267_v25 }
  0x67   :  { %1172 = vmatmul.mubr.bf16.gmra.mrb[16].mxu0 %v1268_v26  ;;  %1204 = vmatmul.mubr.bf16.gmra.mrb[16].mxu1 %v1269_v27 }
  0x68   :  { %1175 = vmatprep.mubr.bf16.mxu0 %v1270_v28  ;;  %1207 = vmatprep.mubr.bf16.mxu1 %v1271_v29 }
  0x6f   :  { %1176 = vmatmul.mubr.bf16.gmra.mrb[20].mxu0 %v1272_v30  ;;  %1208 = vmatmul.mubr.bf16.gmra.mrb[20].mxu1 %v1273_v31 }
  0x70   :  { %1179 = vmatprep.mubr.bf16.mxu0 %v1274_v32  ;;  %1211 = vmatprep.mubr.bf16.mxu1 %v1275_v33 }
  0x77   :  { %1180 = vmatmul.mubr.bf16.gmra.mrb[24].mxu0 %v1276_v34  ;;  %1212 = vmatmul.mubr.bf16.gmra.mrb[24].mxu1 %v1277_v35 }
  0x78   :  { %1183 = vmatprep.mubr.bf16.mxu0 %v1278_v36  ;;  %1215 = vmatprep.mubr.bf16.mxu1 %v1279_v37 }
  0x7f   :  { %1184 = vmatmul.mubr.bf16.gmra.mrb[28].mxu0 %v1280_v38  ;;  %1216 = vmatmul.mubr.bf16.gmra.mrb[28].mxu1 %v1281_v39 }
 0x11a   :  { %v1157_v40 = vpop.f32.mrb[0].mxu0  ;;  %v1189_v41 = vpop.f32.mrb[0].mxu1 }
 0x11b   :  { %979 = vst [vmem:[#allocation8 + $0x10] sm:$0xff] %v1157_v40  ;;  %1011 = vst [vmem:[#allocation8 + $0x110] sm:$0xff] %v1189_v41  ;;  %v527_v42 = vpop.f32.mrb[1].mxu0  ;;  %v655_v43 = vpop.f32.mrb[1].mxu1 }
 0x11c   :  { %977 = vst [vmem:[#allocation8] sm:$0xff] %v527_v42  ;;  %1009 = vst [vmem:[#allocation8 + $0x100] sm:$0xff] %v655_v43  ;;  %v1158_v44 = vpop.f32.mrb[2].mxu0  ;;  %v1190_v45 = vpop.f32.mrb[2].mxu1 }
 0x11d   :  { %980 = vst [vmem:[#allocation8 + $0x18] sm:$0xff] %v1158_v44  ;;  %1012 = vst [vmem:[#allocation8 + $0x118] sm:$0xff] %v1190_v45  ;;  %v530_v46 = vpop.f32.mrb[3].mxu0  ;;  %v658_v47 = vpop.f32.mrb[3].mxu1 }
 0x11e   :  { %978 = vst [vmem:[#allocation8 + $0x8] sm:$0xff] %v530_v46  ;;  %1010 = vst [vmem:[#allocation8 + $0x108] sm:$0xff] %v658_v47 }
 0x122   :  { %v1161_v48 = vpop.f32.mrb[4].mxu0  ;;  %v1193_v49 = vpop.f32.mrb[4].mxu1 }
 0x123   :  { %983 = vst [vmem:[#allocation8 + $0x30] sm:$0xff] %v1161_v48  ;;  %1015 = vst [vmem:[#allocation8 + $0x130] sm:$0xff] %v1193_v49  ;;  %v543_v50 = vpop.f32.mrb[5].mxu0  ;;  %v671_v51 = vpop.f32.mrb[5].mxu1 }
 0x124   :  { %981 = vst [vmem:[#allocation8 + $0x20] sm:$0xff] %v543_v50  ;;  %1013 = vst [vmem:[#allocation8 + $0x120] sm:$0xff] %v671_v51  ;;  %v1162_v52 = vpop.f32.mrb[6].mxu0  ;;  %v1194_v53 = vpop.f32.mrb[6].mxu1 }
 0x125   :  { %984 = vst [vmem:[#allocation8 + $0x38] sm:$0xff] %v1162_v52  ;;  %1016 = vst [vmem:[#allocation8 + $0x138] sm:$0xff] %v1194_v53  ;;  %v546_v54 = vpop.f32.mrb[7].mxu0  ;;  %v674_v55 = vpop.f32.mrb[7].mxu1 }
 0x126   :  { %982 = vst [vmem:[#allocation8 + $0x28] sm:$0xff] %v546_v54  ;;  %1014 = vst [vmem:[#allocation8 + $0x128] sm:$0xff] %v674_v55 }
 0x12a   :  { %v1165_v56 = vpop.f32.mrb[8].mxu0  ;;  %v1197_v57 = vpop.f32.mrb[8].mxu1 }
 0x12b   :  { %987 = vst [vmem:[#allocation8 + $0x50] sm:$0xff] %v1165_v56  ;;  %1019 = vst [vmem:[#allocation8 + $0x150] sm:$0xff] %v1197_v57  ;;  %v559_v58 = vpop.f32.mrb[9].mxu0  ;;  %v687_v59 = vpop.f32.mrb[9].mxu1 }
 0x12c   :  { %985 = vst [vmem:[#allocation8 + $0x40] sm:$0xff] %v559_v58  ;;  %1017 = vst [vmem:[#allocation8 + $0x140] sm:$0xff] %v687_v59  ;;  %v1166_v60 = vpop.f32.mrb[10].mxu0  ;;  %v1198_v61 = vpop.f32.mrb[10].mxu1 }
 0x12d   :  { %988 = vst [vmem:[#allocation8 + $0x58] sm:$0xff] %v1166_v60  ;;  %1020 = vst [vmem:[#allocation8 + $0x158] sm:$0xff] %v1198_v61  ;;  %v562_v62 = vpop.f32.mrb[11].mxu0  ;;  %v690_v63 = vpop.f32.mrb[11].mxu1 }
 0x12e   :  { %986 = vst [vmem:[#allocation8 + $0x48] sm:$0xff] %v562_v62  ;;  %1018 = vst [vmem:[#allocation8 + $0x148] sm:$0xff] %v690_v63 }
 0x132   :  { %v1169_v0 = vpop.f32.mrb[12].mxu0  ;;  %v1201_v1 = vpop.f32.mrb[12].mxu1 }
 0x133   :  { %991 = vst [vmem:[#allocation8 + $0x70] sm:$0xff] %v1169_v0  ;;  %1023 = vst [vmem:[#allocation8 + $0x170] sm:$0xff] %v1201_v1  ;;  %v575_v2 = vpop.f32.mrb[13].mxu0  ;;  %v703_v3 = vpop.f32.mrb[13].mxu1 }
 0x134   :  { %989 = vst [vmem:[#allocation8 + $0x60] sm:$0xff] %v575_v2  ;;  %1021 = vst [vmem:[#allocation8 + $0x160] sm:$0xff] %v703_v3  ;;  %v1170_v4 = vpop.f32.mrb[14].mxu0  ;;  %v1202_v5 = vpop.f32.mrb[14].mxu1 }
 0x135   :  { %992 = vst [vmem:[#allocation8 + $0x78] sm:$0xff] %v1170_v4  ;;  %1024 = vst [vmem:[#allocation8 + $0x178] sm:$0xff] %v1202_v5  ;;  %v578_v6 = vpop.f32.mrb[15].mxu0  ;;  %v706_v7 = vpop.f32.mrb[15].mxu1 }
 0x136   :  { %990 = vst [vmem:[#allocation8 + $0x68] sm:$0xff] %v578_v6  ;;  %1022 = vst [vmem:[#allocation8 + $0x168] sm:$0xff] %v706_v7 }
 0x13a   :  { %v1173_v8 = vpop.f32.mrb[16].mxu0  ;;  %v1205_v9 = vpop.f32.mrb[16].mxu1 }
 0x13b   :  { %995 = vst [vmem:[#allocation8 + $0x90] sm:$0xff] %v1173_v8  ;;  %1027 = vst [vmem:[#allocation8 + $0x190] sm:$0xff] %v1205_v9  ;;  %v591_v10 = vpop.f32.mrb[17].mxu0  ;;  %v719_v11 = vpop.f32.mrb[17].mxu1 }
 0x13c   :  { %993 = vst [vmem:[#allocation8 + $0x80] sm:$0xff] %v591_v10  ;;  %1025 = vst [vmem:[#allocation8 + $0x180] sm:$0xff] %v719_v11  ;;  %v1174_v12 = vpop.f32.mrb[18].mxu0  ;;  %v1206_v13 = vpop.f32.mrb[18].mxu1 }
 0x13d   :  { %996 = vst [vmem:[#allocation8 + $0x98] sm:$0xff] %v1174_v12  ;;  %1028 = vst [vmem:[#allocation8 + $0x198] sm:$0xff] %v1206_v13  ;;  %v594_v14 = vpop.f32.mrb[19].mxu0  ;;  %v722_v15 = vpop.f32.mrb[19].mxu1 }
 0x13e   :  { %994 = vst [vmem:[#allocation8 + $0x88] sm:$0xff] %v594_v14  ;;  %1026 = vst [vmem:[#allocation8 + $0x188] sm:$0xff] %v722_v15 }
 0x142   :  { %v1177_v16 = vpop.f32.mrb[20].mxu0  ;;  %v1209_v17 = vpop.f32.mrb[20].mxu1 }
 0x143   :  { %999 = vst [vmem:[#allocation8 + $0xb0] sm:$0xff] %v1177_v16  ;;  %1031 = vst [vmem:[#allocation8 + $0x1b0] sm:$0xff] %v1209_v17  ;;  %v607_v18 = vpop.f32.mrb[21].mxu0  ;;  %v735_v19 = vpop.f32.mrb[21].mxu1 }
 0x144   :  { %997 = vst [vmem:[#allocation8 + $0xa0] sm:$0xff] %v607_v18  ;;  %1029 = vst [vmem:[#allocation8 + $0x1a0] sm:$0xff] %v735_v19  ;;  %v1178_v20 = vpop.f32.mrb[22].mxu0  ;;  %v1210_v21 = vpop.f32.mrb[22].mxu1 }
 0x145   :  { %1000 = vst [vmem:[#allocation8 + $0xb8] sm:$0xff] %v1178_v20  ;;  %1032 = vst [vmem:[#allocation8 + $0x1b8] sm:$0xff] %v1210_v21  ;;  %v610_v22 = vpop.f32.mrb[23].mxu0  ;;  %v738_v23 = vpop.f32.mrb[23].mxu1 }
 0x146   :  { %998 = vst [vmem:[#allocation8 + $0xa8] sm:$0xff] %v610_v22  ;;  %1030 = vst [vmem:[#allocation8 + $0x1a8] sm:$0xff] %v738_v23 }
 0x14a   :  { %v1181_v24 = vpop.f32.mrb[24].mxu0  ;;  %v1213_v25 = vpop.f32.mrb[24].mxu1 }
 0x14b   :  { %1003 = vst [vmem:[#allocation8 + $0xd0] sm:$0xff] %v1181_v24  ;;  %1035 = vst [vmem:[#allocation8 + $0x1d0] sm:$0xff] %v1213_v25  ;;  %v623_v26 = vpop.f32.mrb[25].mxu0  ;;  %v751_v27 = vpop.f32.mrb[25].mxu1 }
 0x14c   :  { %1001 = vst [vmem:[#allocation8 + $0xc0] sm:$0xff] %v623_v26  ;;  %1033 = vst [vmem:[#allocation8 + $0x1c0] sm:$0xff] %v751_v27  ;;  %v1182_v28 = vpop.f32.mrb[26].mxu0  ;;  %v1214_v29 = vpop.f32.mrb[26].mxu1 }
 0x14d   :  { %1004 = vst [vmem:[#allocation8 + $0xd8] sm:$0xff] %v1182_v28  ;;  %1036 = vst [vmem:[#allocation8 + $0x1d8] sm:$0xff] %v1214_v29  ;;  %v626_v30 = vpop.f32.mrb[27].mxu0  ;;  %v754_v31 = vpop.f32.mrb[27].mxu1 }
 0x14e   :  { %1002 = vst [vmem:[#allocation8 + $0xc8] sm:$0xff] %v626_v30  ;;  %1034 = vst [vmem:[#allocation8 + $0x1c8] sm:$0xff] %v754_v31 }
 0x152   :  { %v1185_v32 = vpop.f32.mrb[28].mxu0  ;;  %v1217_v33 = vpop.f32.mrb[28].mxu1 }
 0x153   :  { %1007 = vst [vmem:[#allocation8 + $0xf0] sm:$0xff] %v1185_v32  ;;  %1039 = vst [vmem:[#allocation8 + $0x1f0] sm:$0xff] %v1217_v33  ;;  %v639_v34 = vpop.f32.mrb[29].mxu0  ;;  %v767_v35 = vpop.f32.mrb[29].mxu1 }
 0x154   :  { %1005 = vst [vmem:[#allocation8 + $0xe0] sm:$0xff] %v639_v34  ;;  %1037 = vst [vmem:[#allocation8 + $0x1e0] sm:$0xff] %v767_v35  ;;  %v1186_v36 = vpop.f32.mrb[30].mxu0  ;;  %v1218_v37 = vpop.f32.mrb[30].mxu1 }
 0x155   :  { %1008 = vst [vmem:[#allocation8 + $0xf8] sm:$0xff] %v1186_v36  ;;  %1040 = vst [vmem:[#allocation8 + $0x1f8] sm:$0xff] %v1218_v37  ;;  %v642_v38 = vpop.f32.mrb[31].mxu0  ;;  %v770_v39 = vpop.f32.mrb[31].mxu1 }
 0x156   :  { %1006 = vst [vmem:[#allocation8 + $0xe8] sm:$0xff] %v642_v38  ;;  %1038 = vst [vmem:[#allocation8 + $0x1e8] sm:$0xff] %v770_v39 }
 0x157   :  { %1337 = shalt.err (!%p1334_p6)
}
 0x158   :  { %s1338_s10 = scalar_lea.hbm %s1414_s2, 8192 }
 0x159   :  { %p1339_p7 = scmp.ne.s32.totalorder %s1414_s2, %s1338_s10  ;;  %p1342_p8 = scmp.lt.u32.totalorder %s1338_s10, %s1414_s2 }
 0x15b   :  { %p1344_p9 = pnand %p1342_p8, %p1339_p7 }
 0x15d   :  { %1347 = shalt.err (!%p1344_p9)
}
 0x15e   :  { %s1359_s15 = smov 128   ;;  %s1360_s16 = smov 8  }
 0x15f   :  { %1052 = dma.vmem_to_hbm [thread:$0]  %s1047_s6, 8192, %s1414_s2, [#allocation5], %s1359_s15, %s1359_s15, %s1360_s16  }
 0x160   :  { %1352 = dma.done.wait [#allocation5], 8192  }
 0x161   :  { %1353 = vsyncadd [#allocation5], 4294959104 }
 0x162   :  { %1056 = vsyncpa [#allocation4], 1 }
 0x163   :  { %1057 = vsyncpa [#allocation7], 1 }
 0x164   :  { %1058 = vsyncpa [#allocation5], 1 }

</bundles_post_ra>
